<compile_context>
chip_gen: v5e
topology: v5e:2x2
jax: 0.10.0
libtpu: 0.0.40
codegen_flags: <defaults>
</compile_context>

<pallas_src>
import jax
import jax.numpy as jnp
from jax.experimental import pallas as pl
from jax.experimental.pallas import tpu as pltpu


def _round_up(x, m):
    return ((x + m - 1) // m) * m


def _choose_tile(dim, align, cap):
    """Pick (tile, padded_dim): tile % align == 0, tile <= cap, padded_dim = tile * nblocks.

    Minimizes the number of blocks first, then the padding for that block
    count (avoids rounding the dim up to a full large-tile multiple).
    """
    dim = _round_up(max(dim, 1), align)
    nb = 1
    while True:
        tile = _round_up(-(-dim // nb), align)
        if tile <= cap:
            return tile, tile * nb
        nb += 1


def _pad2d(a, rows, cols):
    r, c = a.shape
    if r == rows and c == cols:
        return a
    return jnp.pad(a, ((0, rows - r), (0, cols - c)))


def _linear_kernel_single_k(x_ref, w_ref, b_ref, o_ref):
    # x: (tm, Kp)  w: (Kp, tn)  b: (1, tn)  o: (tm, tn)
    acc = jnp.dot(x_ref[...], w_ref[...], preferred_element_type=jnp.float32)
    o_ref[...] = (acc + b_ref[...].astype(jnp.float32)).astype(o_ref.dtype)


def _linear_kernel_k_loop(x_ref, w_ref, b_ref, o_ref, acc_ref):
    # x: (tm, tk)  w: (tk, tn)  b: (1, tn)  o: (tm, tn)  acc: (tm, tn) f32
    k = pl.program_id(2)

    @pl.when(k == 0)
    def _init():
        acc_ref[...] = jnp.zeros_like(acc_ref)

    acc_ref[...] += jnp.dot(x_ref[...], w_ref[...],
                            preferred_element_type=jnp.float32)

    @pl.when(k == pl.num_programs(2) - 1)
    def _finalize():
        o_ref[...] = (acc_ref[...] + b_ref[...].astype(jnp.float32)).astype(o_ref.dtype)


def linear_block_forward(x, weight, bias, *, tm_max=512, tn_max=512, tk_max=1024):
    """y = x @ weight.T + bias  (weight: (out_dim, in_dim), bias: (out_dim,))."""
    out_dim, in_dim = weight.shape
    assert x.shape[-1] == in_dim
    assert bias.shape == (out_dim,)

    lead_shape = x.shape[:-1]
    x2d = x.reshape(-1, in_dim)  # (M, K)
    m, k_dim, n_dim = x2d.shape[0], in_dim, out_dim

    # --- Tile / padding selection ------------------------------------------
    tm, m_pad = _choose_tile(m, 8, tm_max)        # sublane-aligned
    tk, k_pad = _choose_tile(k_dim, 128, tk_max)  # lane-aligned
    tn, n_pad = _choose_tile(n_dim, 128, tn_max)  # lane-aligned (lane-dense stores)

    num_i, num_j, num_k = m_pad // tm, n_pad // tn, k_pad // tk

    # Megacore guarantee (v7x): keep at least one parallel axis with extent >= 2.
    if num_i == 1 and num_j == 1 and m_pad >= 16:
        tm = _round_up(-(-m_pad // 2), 8)
        m_pad = 2 * tm
        num_i = 2

    # --- Operand preparation (one-time, wrapper-side) -----------------------
    x_p = _pad2d(x2d, m_pad, k_pad)                    # (Mp, Kp); no-op if aligned
    w_p = _pad2d(weight, n_pad, k_pad).T               # (Kp, Np): one-time transpose
    b_p = _pad2d(bias.reshape(1, n_dim), 1, n_pad)     # (1, Np)

    itemsize = jnp.dtype(x.dtype).itemsize

    # --- Grid / specs --------------------------------------------------------
    if num_k == 1:
        # K fits one tile: no K loop, no accumulator scratch; W block constant
        # across the inner M sweep -> VMEM-resident weight.
        grid = (num_j, num_i)
        kernel = _linear_kernel_single_k
        in_specs = [
            pl.BlockSpec((tm, k_pad), lambda j, i: (i, 0)),   # x tile
            pl.BlockSpec((k_pad, tn), lambda j, i: (0, j)),   # W tile (resident per j)
            pl.BlockSpec((1, tn), lambda j, i: (0, j)),       # bias tile
        ]
        out_specs = pl.BlockSpec((tm, tn), lambda j, i: (i, j))
        scratch_shapes = []
        semantics = ("parallel", "parallel")
        w_reads = 1
    else:
        grid = (num_j, num_i, num_k)
        kernel = _linear_kernel_k_loop
        in_specs = [
            pl.BlockSpec((tm, tk), lambda j, i, k: (i, k)),
            pl.BlockSpec((tk, tn), lambda j, i, k: (k, j)),
            pl.BlockSpec((1, tn), lambda j, i, k: (0, j)),
        ]
        out_specs = pl.BlockSpec((tm, tn), lambda j, i, k: (i, j))
        scratch_shapes = [pltpu.VMEM((tm, tn), jnp.float32)]
        semantics = ("parallel", "parallel", "arbitrary")
        w_reads = num_i

    # --- Cost estimate (account for grid fan-out re-reads) -------------------
    bytes_accessed = itemsize * (
        num_j * m_pad * k_pad      # x re-read once per output-column block
        + w_reads * k_pad * n_pad  # W re-reads
        + m_pad * n_pad            # output write
        + n_pad                    # bias
    )
    cost = pl.CostEstimate(
        flops=2 * m_pad * n_pad * k_pad,
        transcendentals=0,
        bytes_accessed=int(bytes_accessed),
    )

    # --- VMEM budget (double-buffered in/out + accumulator) ------------------
    acc_bytes = 4 * tm * tn if num_k > 1 else 0
    vmem_needed = 2 * itemsize * (tm * tk + tk * tn + tm * tn + tn) + acc_bytes
    vmem_limit = int(min(max(2 * vmem_needed, 16 << 20), 40 << 20))

    y2d = pl.pallas_call(
        kernel,
        out_shape=jax.ShapeDtypeStruct((m_pad, n_pad), x.dtype),
        grid_spec=pltpu.PrefetchScalarGridSpec(
            num_scalar_prefetch=0,
            grid=grid,
            in_specs=in_specs,
            out_specs=out_specs,
            scratch_shapes=scratch_shapes,
        ),
        compiler_params=pltpu.CompilerParams(
            dimension_semantics=semantics,
            vmem_limit_bytes=vmem_limit,
        ),
        cost_estimate=cost,
    )(x_p, w_p, b_p)

    y2d = y2d[:m, :n_dim]
    return y2d.reshape(*lead_shape, out_dim)


if __name__ == "__main__":
    key = jax.random.PRNGKey(0)

    # --- Test 1: small shapes consistent with the module ---------------------
    # batch=2, seq=8, input_dim=32, output_dim=64 (mid_hidden/dropout unused).
    batch, seq, input_dim, output_dim = 2, 8, 32, 64
    kx, kw, kb, key = jax.random.split(key, 4)

    bound = 1.0 / (input_dim ** 0.5)  # mimic nn.Linear init
    weight = jax.random.uniform(kw, (output_dim, input_dim),
                                minval=-bound, maxval=bound, dtype=jnp.float32)
    bias = jax.random.uniform(kb, (output_dim,),
                              minval=-bound, maxval=bound, dtype=jnp.float32)
    x = jax.random.normal(kx, (batch, seq, input_dim), dtype=jnp.float32)

    y = jax.block_until_ready(linear_block_forward(x, weight, bias))
    y_ref = x @ weight.T + bias
    assert y.shape == (batch, seq, output_dim)
    assert jnp.allclose(y, y_ref, atol=1e-5, rtol=1e-5)

    # --- Test 2: non-aligned shapes (exercises minimal padding + megacore split)
    b2, s2, in2, out2 = 3, 130, 200, 300
    kx2, kw2, kb2, key = jax.random.split(key, 4)
    bound2 = 1.0 / (in2 ** 0.5)
    w2 = jax.random.uniform(kw2, (out2, in2), minval=-bound2, maxval=bound2,
                            dtype=jnp.float32)
    bb2 = jax.random.uniform(kb2, (out2,), minval=-bound2, maxval=bound2,
                             dtype=jnp.float32)
    x2 = jax.random.normal(kx2, (b2, s2, in2), dtype=jnp.float32)

    y2 = jax.block_until_ready(linear_block_forward(x2, w2, bb2))
    y2_ref = x2 @ w2.T + bb2
    assert y2.shape == (b2, s2, out2)
    assert jnp.allclose(y2, y2_ref, atol=1e-4, rtol=1e-4)

    # --- Test 3: large K (exercises the K-loop / accumulator path) -----------
    b3, s3, in3, out3 = 2, 32, 1500, 256
    kx3, kw3, kb3, key = jax.random.split(key, 4)
    bound3 = 1.0 / (in3 ** 0.5)
    w3 = jax.random.uniform(kw3, (out3, in3), minval=-bound3, maxval=bound3,
                            dtype=jnp.float32)
    bb3 = jax.random.uniform(kb3, (out3,), minval=-bound3, maxval=bound3,
                             dtype=jnp.float32)
    x3 = jax.random.normal(kx3, (b3, s3, in3), dtype=jnp.float32)

    y3 = jax.block_until_ready(linear_block_forward(x3, w3, bb3))
    y3_ref = x3 @ w3.T + bb3
    assert y3.shape == (b3, s3, out3)
    assert jnp.allclose(y3, y3_ref, atol=1e-3, rtol=1e-3)

    print("KERNEL_OK")
</pallas_src>

<mosaic_0001>
module attributes {stable_mosaic.version = 11 : i64} {
  func.func @_linear_kernel_single_k(%arg0: i32, %arg1: i32, %arg2: memref<8x128xf32, #tpu.memory_space<vmem>>, %arg3: memref<128x128xf32, #tpu.memory_space<vmem>>, %arg4: memref<1x128xf32, #tpu.memory_space<vmem>>, %arg5: memref<8x128xf32, #tpu.memory_space<vmem>>) attributes {dimension_semantics = [#tpu.dimension_semantics<parallel>, #tpu.dimension_semantics<parallel>], iteration_bounds = array<i64: 1, 2>, scalar_prefetch = 0 : i64, scratch_operands = 0 : i64, tpu.core_type = #tpu.core_type<tc>, window_params = [{transform_indices = @transform_0, window_bounds = array<i64: 8, 128>}, {transform_indices = @transform_1, window_bounds = array<i64: 128, 128>}, {transform_indices = @transform_2, window_bounds = array<i64: 1, 128>}, {transform_indices = @transform_3, window_bounds = array<i64: 8, 128>}]} {
    %c0 = arith.constant 0 : index
    %c0_0 = arith.constant 0 : index
    %0 = vector.load %arg2[%c0, %c0_0] : memref<8x128xf32, #tpu.memory_space<vmem>>, vector<8x128xf32>
    %c0_1 = arith.constant 0 : index
    %c0_2 = arith.constant 0 : index
    %1 = vector.load %arg3[%c0_1, %c0_2] : memref<128x128xf32, #tpu.memory_space<vmem>>, vector<128x128xf32>
    %cst = arith.constant dense<0.000000e+00> : vector<8x128xf32>
    %2 = tpu.matmul %0, %1, %cst {dimension_numbers = #tpu.dot_dimension_numbers<[1], [0], [0], [1], [0, 0, 1, 1], [], []>} : vector<8x128xf32>, vector<128x128xf32>, vector<8x128xf32> -> vector<8x128xf32>
    %c0_3 = arith.constant 0 : index
    %c0_4 = arith.constant 0 : index
    %3 = vector.load %arg4[%c0_3, %c0_4] : memref<1x128xf32, #tpu.memory_space<vmem>>, vector<1x128xf32>
    %4 = vector.broadcast %3 : vector<1x128xf32> to vector<8x128xf32>
    %5 = arith.addf %2, %4 : vector<8x128xf32>
    %c0_5 = arith.constant 0 : index
    %c0_6 = arith.constant 0 : index
    %6 = vector.load %arg5[%c0_5, %c0_6] : memref<8x128xf32, #tpu.memory_space<vmem>>, vector<8x128xf32>
    tpu.vector_store %arg5[%c0_5, %c0_6], %5 {strides = array<i32>} : memref<8x128xf32, #tpu.memory_space<vmem>>, vector<8x128xf32>,
    return
  }
  func.func @transform_0(%arg0: i32, %arg1: i32) -> (i32, i32) {
    %c0_i32 = arith.constant 0 : i32
    %c0_i32_0 = arith.constant 0 : i32
    return %arg1, %c0_i32 : i32, i32
  }
  func.func @transform_1(%arg0: i32, %arg1: i32) -> (i32, i32) {
    %c0_i32 = arith.constant 0 : i32
    %c0_i32_0 = arith.constant 0 : i32
    return %c0_i32, %arg0 : i32, i32
  }
  func.func @transform_2(%arg0: i32, %arg1: i32) -> (i32, i32) {
    %c0_i32 = arith.constant 0 : i32
    %c0_i32_0 = arith.constant 0 : i32
    return %c0_i32, %arg0 : i32, i32
  }
  func.func @transform_3(%arg0: i32, %arg1: i32) -> (i32, i32) {
    %c0_i32 = arith.constant 0 : i32
    return %arg1, %arg0 : i32, i32
  }
}

</mosaic_0001>

<bundles_post_ra>
// kernel: tpu_custom_call.1
= control target key start
LH: loop header
LB: loop body
LE: loop exit
PB: predicated region body
PF: predicated region fallthrough
CT: control target
= control target key end

     0   :  { %8 = vsyncpa [#allocation3], 0  ;;  %s818_s0 = inlined_call_operand.hbm [shape: f32[16,128], index: 0, kind: input, shape index: {}]   ;;  %s819_s1 = inlined_call_operand.hbm [shape: f32[128,128], index: 1, kind: input, shape index: {}]   ;;  %s820_s2 = inlined_call_operand.vmem [shape: f32[1,128], index: 2, kind: input, shape index: {}]   ;;  %s821_s3 = inlined_call_operand.hbm [shape: f32[16,128], index: 3, kind: output, shape index: {}]  }
   0x1   :  { %10 = vsyncpa [#allocation3 + $0x1], 0 }
   0x2   :  { %11 = vsyncpa [#allocation6], 0 }
   0x3   :  { %12 = vsyncpa [#allocation4], 0 }
   0x4   :  { %14 = vsyncpa [#allocation4 + $0x1], 0  ;;  %s665_s12 = smov 0   ;;  %s667_s13 = smov 0  }
   0x5   :  { %s669_s14 = smov 0   ;;  %s671_s15 = smov 0  }
   0x6   :  { %s673_s16 = smov 0   ;;  %s675_s17 = smov 0  }
   0x7 LB: > { %s402_s18 = sadd.s32 4294967295, %s640_s17   ;;  %p404_p0 = scmp.ge.s32.totalorder %s640_s17, 1  ;;  %s640_s17 = sphi %s675_s17, %s20_s17   ;;  %s636_s16 = sphi %s673_s16, %s832_s16   ;;  %s632_s15 = sphi %s671_s15, %s831_s15   ;;  %s628_s14 = sphi %s669_s14, %s830_s14   ;;  %s624_s13 = sphi %s667_s13, %s829_s13   ;;  %s620_s12 = sphi %s665_s12, %s828_s12  }
   0x8   : > { %p697_p1 = scmp.eq.s32.totalorder %s402_s18, 0  ;;  %p143_p2 = scmp.lt.s32.totalorder %s640_s17, 3 }
   0x9   : > { %s156_s22 = sshll.u32 %s819_s1, 4  ;;  %s642_s24 = smov [#allocation5]   ;;  %s157_s22 = int_to_ptr.hbm [resolvable:$true] %s156_s22 }
   0xa   : > { %p705_p3 = pnand %p404_p0, %p143_p2  ;;  %s158_s25 = sshll.u32 %s642_s24, 4  ;;  %s159_s25 = int_to_ptr.vmem [resolvable:$true] %s158_s25 }
   0xb   : > { %p407_p6 = scmp.ge.s32.totalorder %s640_s17, 2  ;;  %s643_s26 = smov 128  }
   0xc   : > { %p426_p4 = pneg %p705_p3  ;;  %s644_s27 = smov 8  }
   0xd   : > { %s403_s28 = sadd.s32 4294967294, %s640_s17   ;;  %s29_s29 = sadd.s32 1, %s636_s16 }
   0xe   : > { %p427_p5 = pnand %p426_p4, %p697_p1  ;;  %s39_s30 = sadd.s32 1, %s628_s14 }
   0xf   : > { %p30_p7 = scmp.ge.s32.totalorder %s29_s29, 2  ;;  %p46_p8 = scmp.ne.s32.totalorder %s628_s14, %s624_s13 }
  0x10   : > { %429 = dma.hbm_to_vmem [thread:$0]  (!%p427_p5), %s157_s22, 2048, %s159_s25, [#allocation6], %s643_s26, %s643_s26, %s644_s27  }
  0x11   : > { %p47_p9 = scmp.eq.s32.totalorder %s640_s17, 0  ;;  %p52_p10 = scmp.ne.s32.totalorder %s624_s13, %s620_s12 }
  0x12   : > { %s834_s29 = smov (%p30_p7, %s29_s29), 0  ;;  %p130_p13 = scmp.eq.s32.totalorder %s402_s18, 1 }
  0x13   : > { %p724_p11 = por %p47_p9, %p46_p8  ;;  %p730_p12 = por %p697_p1, %p52_p10 }
  0x14   : > { %s36_s6 = ssub.s32 %s636_s16, %s834_s29  ;;  %p136_p2 = scmp.eq.s32.totalorder %s403_s28, 1 }
  0x15   : > { %p37_p0 = scmp.eq.s32.totalorder %s36_s6, 0  ;;  %p736_p4 = por %p130_p13, %p46_p8 }
  0x16   : > { %p439_p5 = scmp.lt.s32.totalorder %s640_s17, 2  ;;  %p744_p7 = por %p136_p2, %p52_p10 }
  0x17   : > { %s742_s8 = scalar_select %p37_p0, %s628_s14, %s39_s30  }
  0x18   : > { %s178_s10 = sand.u32 1, %s628_s14   ;;  %s409_s20 = sshll.u32 %s636_s16, 3 }
  0x19   : > { %s408_s11 = sshll.u32 %s178_s10, 3  ;;  %s186_s18 = scalar_lea.hbm %s818_s0, %s409_s20 }
  0x1a   : > { %s182_s24 = scalar_lea.vmem [#allocation2], %s408_s11  ;;  %s188_s26 = sshll.u32 %s186_s18, 4  ;;  %s189_s26 = int_to_ptr.hbm [resolvable:$true] %s188_s26 }
  0x1b   : > { %s190_s25 = sshll.u32 %s182_s24, 4  ;;  %p431_p8 = pnand %p439_p5, %p724_p11  ;;  %s191_s25 = int_to_ptr.vmem [resolvable:$true] %s190_s25 }
  0x1c   : > { %s179_s27 = scalar_lea.sflag [#allocation3], %s178_s10  ;;  %199 = sbr.rel (%p705_p3) target bundleno = 199 (0xc7), region = 32 }
  0x1d   : > { %433 = dma.hbm_to_vmem [thread:$0]  (!%p431_p8), %s189_s26, 128, %s191_s25, %s179_s27  }
  0x1e   : > { %s758_s28 = sand.u32 (!%p705_p3), 1, %s624_s13  }
  0x1f   : > { %s411_s30 = sshll.u32 (!%p705_p3), %s758_s28, 3  ;;  %s202_s6 = scalar_lea.sflag (!%p705_p3), [#allocation3], %s758_s28 }
  0x20   : > { %s764_s11 = scalar_lea.vmem (!%p705_p3), [#allocation2], %s411_s30 }
  0x21   : > { %607 = dma.done.wait (%p730_p12), %s202_s6, 128  }
  0x22   : > { %609 = vsyncadd (%p730_p12), %s202_s6, 4294967168 }
  0x23   : > { %611 = dma.done.wait (%p697_p1), [#allocation6], 2048  }
  0x24   : > { %613 = vsyncadd (%p697_p1), [#allocation6], 4294965248  ;;  %v256_v0 = vld [vmem:[#allocation5 + $0x78] sm:$0xff]  ;;  %v255_v1 = vld [vmem:[#allocation5 + $0x70] sm:$0xff]  ;;  %s415_s19 = sshll.u32 %s632_s15, 3  ;;  %s236_s21 = scalar_lea.vmem [#allocation7], %s411_s30 }
  0x25   : > { %261 = vmatpush.msra.mxu0 %v256_v0  ;;  %v254_v2 = vld [vmem:[#allocation5 + $0x68] sm:$0xff]  ;;  %v253_v3 = vld [vmem:[#allocation5 + $0x60] sm:$0xff]  ;;  %v252_v4 = vld [vmem:[#allocation5 + $0x58] sm:$0xff]  ;;  %s294_s5 = scalar_lea.hbm %s821_s3, %s415_s19  ;;  %s296_s22 = sshll.u32 %s236_s21, 4  ;;  %s297_s22 = int_to_ptr.vmem [resolvable:$true] %s296_s22 }
  0x26   : > { %v251_v5 = vld [vmem:[#allocation5 + $0x50] sm:$0xff]  ;;  %v250_v6 = vld [vmem:[#allocation5 + $0x48] sm:$0xff]  ;;  %v249_v7 = vld [vmem:[#allocation5 + $0x40] sm:$0xff]  ;;  %s298_s18 = sshll.u32 %s294_s5, 4  ;;  %s283_s24 = scalar_lea.sflag [#allocation4], %s758_s28  ;;  %s299_s18 = int_to_ptr.hbm [resolvable:$true] %s298_s18 }
  0x27   : > { %262 = vmatpush.msra.mxu0 %v255_v1  ;;  %v248_v8 = vld [vmem:[#allocation5 + $0x38] sm:$0xff]  ;;  %v247_v9 = vld [vmem:[#allocation5 + $0x30] sm:$0xff]  ;;  %v246_v10 = vld [vmem:[#allocation5 + $0x28] sm:$0xff]  ;;  %s568_s15 = sshra.s32 %s299_s18, 4  ;;  %s574_s6 = scalar_lea.hbm %s821_s3, 16  ;;  %s569_s15 = int_to_ptr.hbm [resolvable:$true] %s568_s15 }
  0x28   : > { %v245_v11 = vld [vmem:[#allocation5 + $0x20] sm:$0xff]  ;;  %v244_v12 = vld [vmem:[#allocation5 + $0x18] sm:$0xff]  ;;  %v243_v13 = vld [vmem:[#allocation5 + $0x10] sm:$0xff]  ;;  %s570_s25 = scalar_lea.hbm %s569_s15, 8  ;;  %p575_p10 = scmp.lt.s32.totalorder %s569_s15, %s821_s3 }
  0x29   : > { %263 = vmatpush.msra.mxu0 %v254_v2  ;;  %v242_v14 = vld [vmem:[#allocation5 + $0x8] sm:$0xff]  ;;  %v241_v15 = vld [vmem:[#allocation5] sm:$0xff]  ;;  %v240_v16 = vld [vmem:[%s764_s11] sm:$0xff]  ;;  %p571_p1 = scmp.ne.s32.totalorder %s569_s15, %s570_s25  ;;  %p576_p11 = scmp.lt.s32.totalorder %s574_s6, %s570_s25 }
  0x2a   : > { %v493_v17 = vld [vmem:[%s820_s2] ss:$0 sm:$0xff] }
  0x2b   : > { %264 = vmatpush.msra.mxu0 %v253_v3  ;;  %p572_p3 = pnand %p571_p1, %p736_p4  ;;  %p577_p12 = por %p576_p11, %p575_p10 }
  0x2d   : > { %265 = vmatpush.msra.mxu0 %v252_v4  ;;  %p573_p9 = pneg %p572_p3 }
  0x2f   : > { %266 = vmatpush.msra.mxu0 %v251_v5  ;;  %p578_p13 = pnand %p577_p12, %p573_p9 }
  0x31   : > { %267 = vmatpush.msra.mxu0 %v250_v6 }
  0x33   : > { %268 = vmatpush.msra.mxu0 %v249_v7 }
  0x35   : > { %269 = vmatpush.msra.mxu0 %v248_v8 }
  0x37   : > { %270 = vmatpush.msra.mxu0 %v247_v9 }
  0x39   : > { %271 = vmatpush.msra.mxu0 %v246_v10 }
  0x3b   : > { %272 = vmatpush.msra.mxu0 %v245_v11 }
  0x3d   : > { %273 = vmatpush.msra.mxu0 %v244_v12 }
  0x3f   : > { %274 = vmatpush.msra.mxu0 %v243_v13 }
  0x41   : > { %275 = vmatpush.msra.mxu0 %v242_v14 }
  0x43   : > { %276 = vmatpush.msra.mxu0 %v241_v15 }
  0x44   : > { %277 = vmatmul.f32.vlgmr.msra.gmra.mxu0 %v240_v16 }
  0xc1   : > { %v278_v18 = vpop.f32.mrf.mxu0 }
  0xc2   : > { %v279_v19 = vadd.f32 %v493_v17, %v278_v18 }
  0xc4   : > { %281 = vst [vmem:[%s236_s21] sm:$0xff] %v279_v19 }
  0xc5   : > { %581 = shalt.err (!%p578_p13)
}
  0xc6   : > { %424 = dma.vmem_to_hbm [thread:$0]  (%p736_p4), %s297_s22, 128, %s299_s18, %s283_s24  }
  0xc7 PF: > { %s310_s28 = sand.u32 1, %s620_s12   ;;  %p435_p0 = pnand %p407_p6, %p744_p7 }
  0xc8   : > { %s311_s19 = scalar_lea.sflag [#allocation4], %s310_s28 }
  0xc9   : > { %p436_p2 = pneg %p435_p0 }
  0xcb   : > { %615 = dma.done.wait (%p436_p2), %s311_s19, 128  }
  0xcc   : > { %617 = vsyncadd (%p436_p2), %s311_s19, 4294967168  ;;  %s20_s17 = sadd.s32 1, %s640_s17   ;;  %s828_s12 = smov %s624_s13 }
  0xcd   : > { %p17_p5 = scmp.ge.s32.totalorder %s20_s17, 4   ;;  %s829_s13 = smov %s628_s14 }
  0xce   : > { %s830_s14 = smov %s742_s8  ;;  %s831_s15 = smov %s636_s16 }
  0xcf   : > { %s832_s16 = smov %s834_s29  ;;  %19 = sbr.rel (!%p17_p5) target bundleno = 7 (0x7), region = 85 }
  0xd4   :  { %317 = vsyncpa [#allocation3], 1 }
  0xd5   :  { %319 = vsyncpa [#allocation3 + $0x1], 1 }
  0xd6   :  { %320 = vsyncpa [#allocation6], 1 }
  0xd7   :  { %321 = vsyncpa [#allocation4], 1 }
  0xd8   :  { %323 = vsyncpa [#allocation4 + $0x1], 1 }

</bundles_post_ra>
